<compile_context>
chip_gen: v7x
topology: tpu7x:2x2x1
jax: 0.10.0
libtpu: 0.0.40
codegen_flags: <defaults>
</compile_context>

<pallas_src>
import functools

import jax
import jax.numpy as jnp
from jax.experimental import pallas as pl
from jax.experimental.pallas import tpu as pltpu


def _round_up(x: int, m: int) -> int:
    return (x + m - 1) // m * m


_VMEM_LIMIT_BYTES = 40 * 1024 * 1024   # safe on v5e (128 MiB phys) .. v7x (64 MiB phys)
_MAX_TILE_N = 32768                    # v7x-safe lane-tile cap for small K


def _pick_tile_n(n: int, k: int, in_itemsize: int) -> int:
    """Largest lane tile that fits the VMEM budget, but >= 2 grid steps when possible."""
    # per-lane VMEM bytes: double-buffered input/output blocks + ~14 live f32 intermediates
    per_lane = 2 * 2 * k * in_itemsize + 2 * 4 + 14 * k * 4
    cap = (int(0.6 * _VMEM_LIMIT_BYTES) // per_lane) // 128 * 128
    cap = max(128, min(cap, _MAX_TILE_N))
    if n < 256:
        return n                                  # single block == full array dims
    half = _round_up(pl.cdiv(n, 2), 128)          # keep >= 2 steps for v7x's 2 TCs
    return max(128, min(cap, half))


def _cfnade_kernel(scores_ref, labels_ref, out_ref, *, alpha: float, eps: float):
    s = scores_ref[...].astype(jnp.float32)     # (K, TN): K on sublanes, rows on lanes
    lab = labels_ref[...].astype(jnp.float32)   # (K, TN)
    k = s.shape[0]

    # softmax over the rating axis (sublanes) + eps, matching torch.softmax(dim=2) + eps
    m = jnp.max(s, axis=0, keepdims=True)
    e = jnp.exp(s - m)
    denom = jnp.sum(e, axis=0, keepdims=True)
    probs = e * pl.reciprocal(denom, approx=False) + eps
    logp = jnp.log(probs)

    # regular (categorical) cost, reduced over K per row
    cr = jnp.sum(lab * logp, axis=0, keepdims=True)                 # (1, TN)

    # forward / reverse cumsums along K via tiny triangular matmuls (MXU is idle;
    # exact-ish with HIGHEST precision, avoids f32 cancellation of the complement form).
    row = jax.lax.broadcasted_iota(jnp.int32, (k, k), 0)
    col = jax.lax.broadcasted_iota(jnp.int32, (k, k), 1)
    t_le = (col <= row).astype(jnp.float32)     # lower-tri incl. diag -> forward cumsum
    t_ge = (col >= row).astype(jnp.float32)     # upper-tri incl. diag -> reverse cumsum

    hp = jax.lax.Precision.HIGHEST
    cum_up = jnp.dot(t_le, probs, preferred_element_type=jnp.float32, precision=hp)
    cum_down = jnp.dot(t_ge, probs, preferred_element_type=jnp.float32, precision=hp)
    mask_down = jnp.dot(t_le, lab, preferred_element_type=jnp.float32, precision=hp)
    mask_up = jnp.dot(t_ge, lab, preferred_element_type=jnp.float32, precision=hp)

    cu = jnp.sum((logp - jnp.log(cum_up)) * mask_up, axis=0, keepdims=True)
    cd = jnp.sum((logp - jnp.log(cum_down)) * mask_down, axis=0, keepdims=True)

    # per-row combined cost; OOB lanes of a ragged boundary block are masked on store.
    out_ref[...] = -((1.0 - alpha) * cr + alpha * (cu + cd))


def cfnade_loss(scores, labels, seq_lens, seq_split_indices,
                *, alpha: float = 1.0, reduction: str = "mean",
                eps: float = 1e-6):
    if reduction not in ("sum", "mean"):
        raise NotImplementedError("'reduction' must be one of 'mean' and 'sum'")
    B, M, K = scores.shape
    N = B * M

    # lane-dense re-layout: (B, M, K) -> (K, B*M); rows fill the 128-wide lane axis.
    # TODO(synk): for large bf16 inputs, fuse this transpose into the producer (or do
    # the (rows,K)->(K,rows) relayout in-kernel) to remove one standalone HBM pass.
    s_t = jnp.transpose(scores.reshape(N, K))
    l_t = jnp.transpose(labels.reshape(N, K))

    itemsize = jnp.dtype(scores.dtype).itemsize
    tile_n = _pick_tile_n(N, K, itemsize)
    grid = (pl.cdiv(N, tile_n),)

    kernel = functools.partial(_cfnade_kernel, alpha=float(alpha), eps=float(eps))
    cost = pl.CostEstimate(
        flops=8 * K * K * N + 20 * K * N,
        transcendentals=4 * K * N,
        bytes_accessed=2 * K * N * itemsize + 4 * N,
    )

    per_row = pl.pallas_call(
        kernel,
        out_shape=jax.ShapeDtypeStruct((1, N), jnp.float32),
        grid_spec=pltpu.PrefetchScalarGridSpec(
            num_scalar_prefetch=0,
            grid=grid,
            in_specs=[
                pl.BlockSpec((K, tile_n), lambda i: (0, i)),   # scores (K, rows)
                pl.BlockSpec((K, tile_n), lambda i: (0, i)),   # labels (K, rows)
            ],
            out_specs=pl.BlockSpec((1, tile_n), lambda i: (0, i)),
        ),
        compiler_params=pltpu.CompilerParams(
            dimension_semantics=("parallel",),
            vmem_limit_bytes=_VMEM_LIMIT_BYTES,
        ),
        cost_estimate=cost,
    )(s_t, l_t)

    # per-batch weighting + final reduction on the tiny (B,) vector in plain JAX
    per_row = per_row[0].reshape(B, M)
    cost_b = jnp.sum(per_row, axis=1)
    sl = seq_lens.astype(jnp.float32)
    si = seq_split_indices.astype(jnp.float32)
    cost_b = sl / (sl - si + eps) * cost_b
    return jnp.sum(cost_b) if reduction == "sum" else jnp.mean(cost_b)


def _reference_loss(scores, labels, seq_lens, seq_split_indices,
                    *, alpha=1.0, reduction="mean", eps=1e-6):
    probs = jax.nn.softmax(scores, axis=2) + eps
    cost_regular = -jnp.sum(labels * jnp.log(probs), axis=2)
    cum_up = jnp.cumsum(probs, axis=2)
    cum_down = jnp.flip(jnp.cumsum(jnp.flip(probs, axis=2), axis=2), axis=2)
    mask_up = jnp.flip(jnp.cumsum(jnp.flip(labels, axis=2), axis=2), axis=2)
    mask_down = jnp.cumsum(labels, axis=2)
    cost_up = -jnp.sum((jnp.log(probs) - jnp.log(cum_up)) * mask_up, axis=2)
    cost_down = -jnp.sum((jnp.log(probs) - jnp.log(cum_down)) * mask_down, axis=2)
    cost_ordinal = cost_up + cost_down
    cost = (1 - alpha) * cost_regular.sum(axis=1) + alpha * cost_ordinal.sum(axis=1)
    cost = seq_lens / (seq_lens - seq_split_indices + eps) * cost
    return jnp.sum(cost) if reduction == "sum" else jnp.mean(cost)


if __name__ == "__main__":
    def run_case(B, M, K, alpha, reduction, scale, key):
        k1, k2, k3, k4 = jax.random.split(key, 4)
        scores = scale * jax.random.normal(k1, (B, M, K), dtype=jnp.float32)
        ratings = jax.random.randint(k2, (B, M), 0, K)
        labels = jax.nn.one_hot(ratings, K, dtype=jnp.float32)
        seq_lens = jax.random.randint(k3, (B,), 8, 16).astype(jnp.float32)
        seq_split = jax.random.randint(k4, (B,), 1, 8).astype(jnp.float32)

        out = cfnade_loss(scores, labels, seq_lens, seq_split,
                          alpha=alpha, reduction=reduction)
        out = jax.block_until_ready(out)
        ref = _reference_loss(scores, labels, seq_lens, seq_split,
                              alpha=alpha, reduction=reduction)
        assert jnp.allclose(out, ref, rtol=1e-4, atol=1e-4), (out, ref)

    # small canonical case (single full block)
    run_case(2, 16, 8, 0.5, "mean", 1.0, jax.random.PRNGKey(0))
    # multi-step grid with ragged boundary block + confident (peaked) logits,
    # exercising the reverse-cumsum path that previously suffered cancellation
    run_case(2, 160, 8, 1.0, "sum", 6.0, jax.random.PRNGKey(1))

    print("KERNEL_OK")
</pallas_src>

<mosaic_0001>
module attributes {stable_mosaic.version = 11 : i64} {
  func.func @_cfnade_kernel(%arg0: i32, %arg1: memref<8x32xf32, #tpu.memory_space<vmem>>, %arg2: memref<8x32xf32, #tpu.memory_space<vmem>>, %arg3: memref<1x32xf32, #tpu.memory_space<vmem>>) attributes {dimension_semantics = [#tpu.dimension_semantics<parallel>], iteration_bounds = array<i64: 1>, scalar_prefetch = 0 : i64, scratch_operands = 0 : i64, tpu.core_type = #tpu.core_type<tc>, window_params = [{transform_indices = @transform_0, window_bounds = array<i64: 8, 32>}, {transform_indices = @transform_1, window_bounds = array<i64: 8, 32>}, {transform_indices = @transform_2, window_bounds = array<i64: 1, 32>}]} {
    %c0 = arith.constant 0 : index
    %c0_0 = arith.constant 0 : index
    %0 = vector.load %arg1[%c0, %c0_0] : memref<8x32xf32, #tpu.memory_space<vmem>>, vector<8x32xf32>
    %c0_1 = arith.constant 0 : index
    %c0_2 = arith.constant 0 : index
    %1 = vector.load %arg2[%c0_1, %c0_2] : memref<8x32xf32, #tpu.memory_space<vmem>>, vector<8x32xf32>
    %cst = arith.constant dense<0xFF800000> : vector<32xf32>
    %2 = vector.multi_reduction <maximumf>, %0, %cst [0] : vector<8x32xf32> to vector<32xf32>
    %3 = vector.shape_cast %2 : vector<32xf32> to vector<1x32xf32>
    %4 = vector.broadcast %3 : vector<1x32xf32> to vector<8x32xf32>
    %5 = arith.subf %0, %4 : vector<8x32xf32>
    %6 = math.exp %5 : vector<8x32xf32>
    %cst_3 = arith.constant dense<0.000000e+00> : vector<32xf32>
    %7 = vector.multi_reduction <add>, %6, %cst_3 [0] : vector<8x32xf32> to vector<32xf32>
    %8 = vector.shape_cast %7 : vector<32xf32> to vector<1x32xf32>
    %9 = tpu.reciprocal %8 : vector<1x32xf32> -> vector<1x32xf32>
    %10 = vector.broadcast %9 : vector<1x32xf32> to vector<8x32xf32>
    %11 = arith.mulf %6, %10 : vector<8x32xf32>
    %cst_4 = arith.constant 9.99999997E-7 : f32
    %12 = vector.broadcast %cst_4 : f32 to vector<8x32xf32>
    %13 = arith.addf %11, %12 : vector<8x32xf32>
    %14 = math.log %13 : vector<8x32xf32>
    %15 = arith.mulf %1, %14 : vector<8x32xf32>
    %cst_5 = arith.constant dense<0.000000e+00> : vector<32xf32>
    %16 = vector.multi_reduction <add>, %15, %cst_5 [0] : vector<8x32xf32> to vector<32xf32>
    %17 = vector.shape_cast %16 : vector<32xf32> to vector<1x32xf32>
    %18 = tpu.iota {dimensions = array<i32: 0>} : vector<8x8xi32>
    %19 = tpu.iota {dimensions = array<i32: 1>} : vector<8x8xi32>
    %20 = arith.cmpi sle, %19, %18 : vector<8x8xi32>
    %21 = arith.extui %20 : vector<8x8xi1> to vector<8x8xi32>
    %22 = arith.sitofp %21 : vector<8x8xi32> to vector<8x8xf32>
    %23 = arith.cmpi sge, %19, %18 : vector<8x8xi32>
    %24 = arith.extui %23 : vector<8x8xi1> to vector<8x8xi32>
    %25 = arith.sitofp %24 : vector<8x8xi32> to vector<8x8xf32>
    %cst_6 = arith.constant dense<0.000000e+00> : vector<8x32xf32>
    %26 = tpu.matmul %22, %13, %cst_6 {dimension_numbers = #tpu.dot_dimension_numbers<[1], [0], [0], [1], [0, 0, 1, 1], [], []>, precision = #tpu.contract_precision<fp32>} : vector<8x8xf32>, vector<8x32xf32>, vector<8x32xf32> -> vector<8x32xf32>
    %cst_7 = arith.constant dense<0.000000e+00> : vector<8x32xf32>
    %27 = tpu.matmul %25, %13, %cst_7 {dimension_numbers = #tpu.dot_dimension_numbers<[1], [0], [0], [1], [0, 0, 1, 1], [], []>, precision = #tpu.contract_precision<fp32>} : vector<8x8xf32>, vector<8x32xf32>, vector<8x32xf32> -> vector<8x32xf32>
    %cst_8 = arith.constant dense<0.000000e+00> : vector<8x32xf32>
    %28 = tpu.matmul %22, %1, %cst_8 {dimension_numbers = #tpu.dot_dimension_numbers<[1], [0], [0], [1], [0, 0, 1, 1], [], []>, precision = #tpu.contract_precision<fp32>} : vector<8x8xf32>, vector<8x32xf32>, vector<8x32xf32> -> vector<8x32xf32>
    %cst_9 = arith.constant dense<0.000000e+00> : vector<8x32xf32>
    %29 = tpu.matmul %25, %1, %cst_9 {dimension_numbers = #tpu.dot_dimension_numbers<[1], [0], [0], [1], [0, 0, 1, 1], [], []>, precision = #tpu.contract_precision<fp32>} : vector<8x8xf32>, vector<8x32xf32>, vector<8x32xf32> -> vector<8x32xf32>
    %30 = math.log %26 : vector<8x32xf32>
    %31 = arith.subf %14, %30 : vector<8x32xf32>
    %32 = arith.mulf %31, %29 : vector<8x32xf32>
    %cst_10 = arith.constant dense<0.000000e+00> : vector<32xf32>
    %33 = vector.multi_reduction <add>, %32, %cst_10 [0] : vector<8x32xf32> to vector<32xf32>
    %34 = vector.shape_cast %33 : vector<32xf32> to vector<1x32xf32>
    %35 = math.log %27 : vector<8x32xf32>
    %36 = arith.subf %14, %35 : vector<8x32xf32>
    %37 = arith.mulf %36, %28 : vector<8x32xf32>
    %cst_11 = arith.constant dense<0.000000e+00> : vector<32xf32>
    %38 = vector.multi_reduction <add>, %37, %cst_11 [0] : vector<8x32xf32> to vector<32xf32>
    %39 = vector.shape_cast %38 : vector<32xf32> to vector<1x32xf32>
    %cst_12 = arith.constant 5.000000e-01 : f32
    %40 = vector.broadcast %cst_12 : f32 to vector<1x32xf32>
    %41 = arith.mulf %40, %17 : vector<1x32xf32>
    %42 = arith.addf %34, %39 : vector<1x32xf32>
    %cst_13 = arith.constant 5.000000e-01 : f32
    %43 = vector.broadcast %cst_13 : f32 to vector<1x32xf32>
    %44 = arith.mulf %43, %42 : vector<1x32xf32>
    %45 = arith.addf %41, %44 : vector<1x32xf32>
    %cst_14 = arith.constant 0.000000e+00 : f32
    %46 = vector.broadcast %cst_14 : f32 to vector<1x32xf32>
    %47 = arith.subf %46, %45 : vector<1x32xf32>
    %c0_15 = arith.constant 0 : index
    %c0_16 = arith.constant 0 : index
    %48 = vector.load %arg3[%c0_15, %c0_16] : memref<1x32xf32, #tpu.memory_space<vmem>>, vector<1x32xf32>
    tpu.vector_store %arg3[%c0_15, %c0_16], %47 {strides = array<i32>} : memref<1x32xf32, #tpu.memory_space<vmem>>, vector<1x32xf32>,
    return
  }
  func.func @transform_0(%arg0: i32) -> (i32, i32) {
    %c0_i32 = arith.constant 0 : i32
    %c0_i32_0 = arith.constant 0 : i32
    return %c0_i32, %arg0 : i32, i32
  }
  func.func @transform_1(%arg0: i32) -> (i32, i32) {
    %c0_i32 = arith.constant 0 : i32
    %c0_i32_0 = arith.constant 0 : i32
    return %c0_i32, %arg0 : i32, i32
  }
  func.func @transform_2(%arg0: i32) -> (i32, i32) {
    %c0_i32 = arith.constant 0 : i32
    %c0_i32_0 = arith.constant 0 : i32
    return %c0_i32, %arg0 : i32, i32
  }
}

</mosaic_0001>

<bundles_post_ra>
// kernel: tpu_custom_call.1
= control target key start
LH: loop header
LB: loop body
LE: loop exit
PB: predicated region body
PF: predicated region fallthrough
CT: control target
= control target key end

     0   :  { %7 = vsyncpa [#allocation3], 0  ;;  %s2431_s0 = inlined_call_operand.hbm [shape: f32[8,32], index: 0, kind: input, shape index: {}]   ;;  %s2432_s1 = inlined_call_operand.hbm [shape: f32[8,32], index: 1, kind: input, shape index: {}]   ;;  %s2433_s2 = inlined_call_operand.hbm [shape: f32[1,32], index: 2, kind: output, shape index: {}]  }
   0x1   :  { %8 = vsyncpa [#allocation6], 0 }
   0x2   :  { %9 = vsyncpa [#allocation4], 0  ;;  %s2224_s9 = smov [#allocation2]   ;;  %s2225_s11 = smov [#allocation5]  }
   0x3   :  { %s16_s10 = sshll.u32 %s2224_s9, 4  ;;  %s26_s12 = sshll.u32 %s2225_s11, 4  ;;  %s17_s10 = int_to_ptr.vmem [resolvable:$true] %s16_s10  ;;  %s27_s12 = int_to_ptr.vmem [resolvable:$true] %s26_s12 }
   0x4   :  { %s2152_s15 = scalar_lea.hbm %s2431_s0, 128 }
   0x5   :  { %p2153_p0 = scmp.ne.s32.totalorder %s2431_s0, %s2152_s15  ;;  %p2156_p1 = scmp.lt.u32.totalorder %s2152_s15, %s2431_s0 }
   0x7   :  { %p2158_p2 = pnand %p2156_p1, %p2153_p0 }
   0x9   :  { %2161 = shalt.err (!%p2158_p2)
}
   0xa   :  { %s2162_s20 = scalar_lea.vmem %s17_s10, 128  ;;  %p2167_p4 = scmp.lt.s32.totalorder %s17_s10, %s17_s10 }
   0xb   :  { %p2163_p3 = scmp.ne.s32.totalorder %s17_s10, %s2162_s20  ;;  %p2168_p5 = scmp.lt.s32.totalorder %s2162_s20, %s2162_s20 }
   0xd   :  { %p2169_p6 = por %p2168_p5, %p2167_p4 }
   0xf   :  { %p2170_p7 = pnand %p2169_p6, %p2163_p3 }
  0x11   :  { %2173 = shalt.err (!%p2170_p7)
}
  0x12   :  { %19 = dma.hbm_to_vmem [thread:$0]  %s2431_s0, 128, %s17_s10, [#allocation3]  }
  0x13   :  { %s2174_s25 = scalar_lea.hbm %s2432_s1, 128 }
  0x14   :  { %p2175_p8 = scmp.ne.s32.totalorder %s2432_s1, %s2174_s25  ;;  %p2178_p9 = scmp.lt.u32.totalorder %s2174_s25, %s2432_s1 }
  0x16   :  { %p2180_p10 = pnand %p2178_p9, %p2175_p8 }
  0x18   :  { %2183 = shalt.err (!%p2180_p10)
}
  0x19   :  { %s2184_s30 = scalar_lea.vmem %s27_s12, 128  ;;  %p2189_p12 = scmp.lt.s32.totalorder %s27_s12, %s27_s12 }
  0x1a   :  { %p2185_p11 = scmp.ne.s32.totalorder %s27_s12, %s2184_s30  ;;  %p2190_p13 = scmp.lt.s32.totalorder %s2184_s30, %s2184_s30 }
  0x1c   :  { %p2191_p0 = por %p2190_p13, %p2189_p12 }
  0x1e   :  { %p2192_p1 = pnand %p2191_p0, %p2185_p11 }
  0x20   :  { %2195 = shalt.err (!%p2192_p1)
}
  0x21   :  { %29 = dma.hbm_to_vmem [thread:$0]  %s2432_s1, 128, %s27_s12, [#allocation6]  }
  0x22   :  { %2218 = dma.done.wait [#allocation3], 128  }
  0x23   :  { %2219 = vsyncadd [#allocation3], 4294967168 }
  0x24   :  { %2220 = dma.done.wait [#allocation6], 128  }
  0x25   :  { %2221 = vsyncadd [#allocation6], 4294967168  ;;  %v2226_v0 = vmov 0.0   ;;  %vm2227_vm0 = vmmov 0   ;;  %vm38_vm1 = vcmask 261120   ;;  %v36_v1 = vld [vmem:[#allocation2] sm:$0xff]  ;;  %v69_v11 = vlaneseq }
  0x26   :  { %1977 = vmatprep.subr.mxu0 %v2226_v0  ;;  %2007 = vmatprep.subr.mxu1 %v2226_v0  ;;  %v39_v2 = vsel %vm38_vm1, %v36_v1, -inf  ;;  %vm79_vm4 = vcmask 64512   ;;  %v2336_v42 = vld [vmem:[#allocation5] sm:$0xff]  ;;  %s2228_s1 = smov [#allocation7]   ;;  %vm1897_vm5 = vcmask 253952  }
  0x27   :  { %1979 = vmatprep.mubr.msk.f32.mxu0 %vm2227_vm0, %v2226_v0  ;;  %2009 = vmatprep.mubr.msk.f32.mxu1 %vm2227_vm0, %v2226_v0  ;;  %v40_v3 = vrot.slane %v39_v2, 4  ;;  %v70_v15 = vshrl.u32 %v69_v11, 7  ;;  %v72_v16 = vand.u32 127, %v69_v11  ;;  %v979_v43 = vand.u32 4294901760, %v2336_v42  ;;  %s1905_s4 = sshll.u32 %s2228_s1, 4  ;;  %s1906_s4 = int_to_ptr.vmem [resolvable:$true] %s1905_s4 }
  0x28   :  { %s2196_s5 = scalar_lea.vmem %s1906_s4, 16  ;;  %s2200_s6 = scalar_lea.vmem %s1906_s4, 32 }
  0x29   :  { %v41_v4 = vmax.f32 %v39_v2, %v40_v3  ;;  %vm73_vm2 = vcmp.le.s32.totalorder %v72_v16, %v70_v15  ;;  %vm76_vm3 = vcmp.ge.s32.totalorder %v72_v16, %v70_v15  ;;  %v1056_v44 = vsub.f32 %v2336_v42, %v979_v43  ;;  %p2197_p2 = scmp.ne.s32.totalorder %s1906_s4, %s2196_s5  ;;  %p2201_p3 = scmp.lt.s32.totalorder %s1906_s4, %s1906_s4 }
  0x2a   :  { %v2277_v21 = vsel %vm73_vm2, 1.0, %v2226_v0  ;;  %v2280_v22 = vsel %vm76_vm3, 1.0, %v2226_v0  ;;  %p2202_p4 = scmp.lt.s32.totalorder %s2200_s6, %s2196_s5 }
  0x2b   :  { %v42_v5 = vrot.slane %v41_v4, 2  ;;  %v81_v24 = vsel %vm79_vm4, %v2277_v21, 0  ;;  %v530_v25 = vsel %vm79_vm4, %v2280_v22, 0  ;;  %v1057_v45 = vand.u32 4294901760, %v1056_v44 }
  0x2c   :  { %v2286_v26 = vsub.f32 %v81_v24, %v81_v24  ;;  %v2288_v27 = vsub.f32 %v530_v25, %v530_v25  ;;  %p2203_p5 = por %p2202_p4, %p2201_p3 }
  0x2d   :  { %v43_v6 = vmax.f32 %v41_v4, %v42_v5  ;;  %v1058_v46 = vsub.f32 %v1056_v44, %v1057_v45 }
  0x2e   :  { %v2291_v28 = vand.u32 4294901760, %v2286_v26  ;;  %v2294_v29 = vand.u32 4294901760, %v2288_v27  ;;  %p2204_p6 = pnand %p2203_p5, %p2197_p2 }
  0x2f   :  { %v44_v7 = vrot.slane %v43_v6, 1  ;;  %v1059_v47 = vand.u32 4294901760, %v1058_v46 }
  0x30   :  { %v152_v31 = vsub.f32 %v2286_v26, %v2291_v28  ;;  %v601_v32 = vsub.f32 %v2288_v27, %v2294_v29 }
  0x31   :  { %v45_v8 = vmax.f32 %v43_v6, %v44_v7 }
  0x32   :  { %v2302_v35 = vand.u32 4294901760, %v152_v31  ;;  %v2304_v36 = vand.u32 4294901760, %v601_v32 }
  0x33   :  { %v46_v9 = vsub.f32 %v36_v1, %v45_v8 }
  0x35   :  { %v47_v10 = vmul.f32 1.442695, %v46_v9 }
  0x37   :  { %2142 = vpow2.f32 %v47_v10 }
  0x41   :  { %v2143_v12 = vpop.eup %2142 }
  0x42   :  { %v49_v13 = vsel %vm38_vm1, %v2143_v12, 0.0 }
  0x43   :  { %v50_v14 = vrot.slane %v49_v13, 4 }
  0x45   :  { %v51_v17 = vadd.f32 %v50_v14, %v49_v13 }
  0x47   :  { %v52_v18 = vrot.slane %v51_v17, 2 }
  0x49   :  { %v53_v19 = vadd.f32 %v52_v18, %v51_v17 }
  0x4b   :  { %v54_v20 = vrot.slane %v53_v19, 1 }
  0x4d   :  { %v55_v23 = vadd.f32 %v54_v20, %v53_v19 }
  0x4f   :  { %2144 = vrcp.f32 %v55_v23 }
  0x59   :  { %v2145_v30 = vpop.eup %2144 }
  0x5a   :  { %v57_v33 = vmul.f32 %v2145_v30, %v2143_v12 }
  0x5c   :  { %v2300_v34 = vadd.f32 1e-06, %v57_v33 }
  0x5e   :  { %v84_v37 = vand.u32 4294901760, %v2300_v34  ;;  %2146 = vlog2.f32 %v2300_v34 }
  0x60   :  { %1978 = vmatpush3.msra.mxu0 %v84_v37  ;;  %2008 = vmatpush3.msra.mxu1 %v84_v37  ;;  %v161_v38 = vsub.f32 %v2300_v34, %v84_v37 }
  0x61   :  { %1980 = vmatmul.mubr.f32.vlgmr.msra.gmra.mrb[0].mxu0 %v2302_v35  ;;  %2010 = vmatmul.mubr.f32.vlgmr.msra.gmra.mrb[0].mxu1 %v2304_v36 }
  0x62   :  { %1982 = vmatprep.subr.mxu0 %v2226_v0  ;;  %2012 = vmatprep.subr.mxu1 %v2226_v0  ;;  %v162_v39 = vand.u32 4294901760, %v161_v38 }
  0x63   :  { %1984 = vmatprep.mubr.msk.f32.mxu0 %vm2227_vm0, %v2226_v0  ;;  %2014 = vmatprep.mubr.msk.f32.mxu1 %vm2227_vm0, %v2226_v0 }
  0x64   :  { %v163_v40 = vsub.f32 %v161_v38, %v162_v39 }
  0x66   :  { %v164_v41 = vand.u32 4294901760, %v163_v40 }
  0x68   :  { %1983 = vmatpush3.msra.mxu0 %v164_v41  ;;  %2013 = vmatpush3.msra.mxu1 %v164_v41  ;;  %v2147_v52 = vpop.eup %2146 }
  0x69   :  { %1985 = vmatmul.mubr.msk.f32.vlgmr.msra.gmra.mrb[0].mxu0 %vm79_vm4, %v2277_v21  ;;  %2015 = vmatmul.mubr.msk.f32.vlgmr.msra.gmra.mrb[0].mxu1 %vm79_vm4, %v2280_v22  ;;  %v60_v53 = vmul.f32 0.6931472, %v2147_v52 }
  0x6a   :  { %1987 = vmatprep.subr.mxu0 %v2226_v0  ;;  %2017 = vmatprep.subr.mxu1 %v2226_v0 }
  0x6b   :  { %1988 = vmatpush3.msra.mxu0 %v161_v38  ;;  %1989 = vmatprep.mubr.msk.f32.mxu0 %vm2227_vm0, %v2226_v0  ;;  %v61_v54 = vmul.f32 %v60_v53, %v2336_v42 }
  0x6c   :  { %2018 = vmatpush3.msra.mxu1 %v161_v38  ;;  %2019 = vmatprep.mubr.msk.f32.mxu1 %vm2227_vm0, %v2226_v0 }
  0x6d   :  { %1992 = vmatprep.subr.mxu0 %v2226_v0  ;;  %2022 = vmatprep.subr.mxu1 %v2226_v0  ;;  %v62_v55 = vsel %vm38_vm1, %v61_v54, 0.0 }
  0x6e   :  { %v63_v58 = vrot.slane %v62_v55, 4 }
  0x70   :  { %v64_v61 = vadd.f32 %v63_v58, %v62_v55 }
  0x71   :  { %1990 = vmatmul.mubr.f32.vlgmr.msra.gmra.mrb[0].mxu0 %v2286_v26  ;;  %2020 = vmatmul.mubr.f32.vlgmr.msra.gmra.mrb[0].mxu1 %v2288_v27 }
  0x72   :  { %1993 = vmatpush3.msra.mxu0 %v84_v37  ;;  %1994 = vmatprep.mubr.msk.f32.mxu0 %vm2227_vm0, %v2226_v0  ;;  %v65_v2 = vrot.slane %v64_v61, 2 }
  0x73   :  { %2023 = vmatpush3.msra.mxu1 %v84_v37  ;;  %2024 = vmatprep.mubr.msk.f32.mxu1 %vm2227_vm0, %v2226_v0 }
  0x74   :  { %1997 = vmatprep.subr.mxu0 %v2226_v0  ;;  %2027 = vmatprep.subr.mxu1 %v2226_v0  ;;  %v66_v11 = vadd.f32 %v65_v2, %v64_v61 }
  0x76   :  { %v67_v16 = vrot.slane %v66_v11, 1 }
  0x79   :  { %1995 = vmatmul.mubr.f32.vlgmr.msra.gmra.mrb[0].mxu0 %v2291_v28  ;;  %2025 = vmatmul.mubr.f32.vlgmr.msra.gmra.mrb[0].mxu1 %v2294_v29 }
  0x7a   :  { %1998 = vmatpush3.msra.mxu0 %v162_v39  ;;  %1999 = vmatprep.mubr.msk.f32.mxu0 %vm2227_vm0, %v2226_v0 }
  0x7b   :  { %2028 = vmatpush3.msra.mxu1 %v162_v39  ;;  %2029 = vmatprep.mubr.msk.f32.mxu1 %vm2227_vm0, %v2226_v0 }
  0x7c   :  { %2002 = vmatprep.subr.mxu0 %v2226_v0  ;;  %2032 = vmatprep.subr.mxu1 %v2226_v0 }
  0x81   :  { %2000 = vmatmul.mubr.msk.f32.vlgmr.msra.gmra.mrb[0].mxu0 %vm79_vm4, %v2277_v21  ;;  %2030 = vmatmul.mubr.msk.f32.vlgmr.msra.gmra.mrb[0].mxu1 %vm79_vm4, %v2280_v22 }
  0x82   :  { %2003 = vmatpush3.msra.mxu0 %v84_v37  ;;  %2004 = vmatprep.mubr.msk.f32.mxu0 %vm2227_vm0, %v2226_v0 }
  0x83   :  { %2033 = vmatpush3.msra.mxu1 %v84_v37  ;;  %2034 = vmatprep.mubr.msk.f32.mxu1 %vm2227_vm0, %v2226_v0 }
  0x84   :  { %2037 = vmatprep.subr.mxu0 %v2226_v0  ;;  %2067 = vmatprep.subr.mxu1 %v2226_v0 }
  0x89   :  { %2005 = vmatmul.mubr.msk.f32.vlgmr.msra.gmra.mrb[0].mxu0 %vm79_vm4, %v2277_v21  ;;  %2035 = vmatmul.mubr.msk.f32.vlgmr.msra.gmra.mrb[0].mxu1 %vm79_vm4, %v2280_v22 }
  0x8a   :  { %2038 = vmatpush3.msra.mxu0 %v979_v43  ;;  %2039 = vmatprep.mubr.msk.f32.mxu0 %vm2227_vm0, %v2226_v0 }
  0x8b   :  { %2068 = vmatpush3.msra.mxu1 %v979_v43  ;;  %2069 = vmatprep.mubr.msk.f32.mxu1 %vm2227_vm0, %v2226_v0 }
  0x8c   :  { %2042 = vmatprep.subr.mxu0 %v2226_v0  ;;  %2072 = vmatprep.subr.mxu1 %v2226_v0 }
  0x8d   :  { %2040 = vmatmul.mubr.f32.vlgmr.msra.gmra.mrb[2].mxu0 %v2302_v35  ;;  %2070 = vmatmul.mubr.f32.vlgmr.msra.gmra.mrb[2].mxu1 %v2304_v36 }
  0x8e   :  { %2043 = vmatpush3.msra.mxu0 %v1059_v47  ;;  %2044 = vmatprep.mubr.msk.f32.mxu0 %vm2227_vm0, %v2226_v0 }
  0x8f   :  { %2073 = vmatpush3.msra.mxu1 %v1059_v47  ;;  %2074 = vmatprep.mubr.msk.f32.mxu1 %vm2227_vm0, %v2226_v0 }
  0x90   :  { %2047 = vmatprep.subr.mxu0 %v2226_v0  ;;  %2077 = vmatprep.subr.mxu1 %v2226_v0 }
  0x95   :  { %2045 = vmatmul.mubr.msk.f32.vlgmr.msra.gmra.mrb[2].mxu0 %vm79_vm4, %v2277_v21  ;;  %2075 = vmatmul.mubr.msk.f32.vlgmr.msra.gmra.mrb[2].mxu1 %vm79_vm4, %v2280_v22 }
  0x96   :  { %2048 = vmatpush3.msra.mxu0 %v1056_v44  ;;  %2049 = vmatprep.mubr.msk.f32.mxu0 %vm2227_vm0, %v2226_v0 }
  0x97   :  { %2078 = vmatpush3.msra.mxu1 %v1056_v44  ;;  %2079 = vmatprep.mubr.msk.f32.mxu1 %vm2227_vm0, %v2226_v0 }
  0x98   :  { %2052 = vmatprep.subr.mxu0 %v2226_v0  ;;  %2082 = vmatprep.subr.mxu1 %v2226_v0 }
  0x9d   :  { %2050 = vmatmul.mubr.f32.vlgmr.msra.gmra.mrb[2].mxu0 %v2286_v26  ;;  %2080 = vmatmul.mubr.f32.vlgmr.msra.gmra.mrb[2].mxu1 %v2288_v27 }
  0x9e   :  { %2053 = vmatpush3.msra.mxu0 %v979_v43  ;;  %2054 = vmatprep.mubr.msk.f32.mxu0 %vm2227_vm0, %v2226_v0 }
  0x9f   :  { %2083 = vmatpush3.msra.mxu1 %v979_v43  ;;  %2084 = vmatprep.mubr.msk.f32.mxu1 %vm2227_vm0, %v2226_v0 }
  0xa0   :  { %2057 = vmatprep.subr.mxu0 %v2226_v0  ;;  %2087 = vmatprep.subr.mxu1 %v2226_v0 }
  0xa5   :  { %2055 = vmatmul.mubr.f32.vlgmr.msra.gmra.mrb[2].mxu0 %v2291_v28  ;;  %2085 = vmatmul.mubr.f32.vlgmr.msra.gmra.mrb[2].mxu1 %v2294_v29 }
  0xa6   :  { %2058 = vmatpush3.msra.mxu0 %v1057_v45  ;;  %2059 = vmatprep.mubr.msk.f32.mxu0 %vm2227_vm0, %v2226_v0 }
  0xa7   :  { %2088 = vmatpush3.msra.mxu1 %v1057_v45  ;;  %2089 = vmatprep.mubr.msk.f32.mxu1 %vm2227_vm0, %v2226_v0 }
  0xa8   :  { %2062 = vmatprep.subr.mxu0 %v2226_v0  ;;  %2092 = vmatprep.subr.mxu1 %v2226_v0 }
  0xad   :  { %2060 = vmatmul.mubr.msk.f32.vlgmr.msra.gmra.mrb[2].mxu0 %vm79_vm4, %v2277_v21  ;;  %2090 = vmatmul.mubr.msk.f32.vlgmr.msra.gmra.mrb[2].mxu1 %vm79_vm4, %v2280_v22 }
  0xae   :  { %2063 = vmatpush3.msra.mxu0 %v979_v43  ;;  %2064 = vmatprep.mubr.msk.f32.mxu0 %vm2227_vm0, %v2226_v0 }
  0xaf   :  { %2093 = vmatpush3.msra.mxu1 %v979_v43  ;;  %2094 = vmatprep.mubr.msk.f32.mxu1 %vm2227_vm0, %v2226_v0 }
  0xb5   :  { %2065 = vmatmul.mubr.msk.f32.vlgmr.msra.gmra.mrb[2].mxu0 %vm79_vm4, %v2277_v21  ;;  %2095 = vmatmul.mubr.msk.f32.vlgmr.msra.gmra.mrb[2].mxu1 %vm79_vm4, %v2280_v22  ;;  %v68_v21 = vadd.f32 %v67_v16, %v66_v11 }
  0xb7   :  { %v1892_v24 = vmul.f32 0.5, %v68_v21 }
 0x15c   :  { %v525_v48 = vpop.f32.mrb[0].mxu0  ;;  %v974_v49 = vpop.f32.mrb[0].mxu1 }
 0x15d   :  { %v2006_v50 = vpop.f32.mrb[1].mxu0  ;;  %v2036_v51 = vpop.f32.mrb[1].mxu1  ;;  %2148 = vlog2.f32 %v525_v48 }
 0x15e   :  { %2150 = vlog2.f32 %v974_v49 }
 0x167   :  { %v2149_v56 = vpop.eup %2148 }
 0x168   :  { %v2151_v57 = vpop.eup %2150  ;;  %v1871_v59 = vmul.f32 0.6931472, %v2149_v56 }
 0x169   :  { %v1882_v60 = vmul.f32 0.6931472, %v2151_v57 }
 0x16a   :  { %v1872_v63 = vsub.f32 %v60_v53, %v1871_v59 }
 0x16b   :  { %v1883_v62 = vsub.f32 %v60_v53, %v1882_v60 }
 0x188   :  { %v1420_v0 = vpop.f32.mrb[2].mxu0  ;;  %v1866_v1 = vpop.f32.mrb[2].mxu1 }
 0x189   :  { %v1884_v3 = vmul.f32 %v1883_v62, %v1420_v0  ;;  %v1873_v4 = vmul.f32 %v1872_v63, %v1866_v1  ;;  %v2066_v5 = vpop.f32.mrb[3].mxu0  ;;  %v2096_v6 = vpop.f32.mrb[3].mxu1 }
 0x18b   :  { %v1885_v7 = vsel %vm38_vm1, %v1884_v3, 0.0  ;;  %v1874_v8 = vsel %vm38_vm1, %v1873_v4, 0.0 }
 0x18c   :  { %v1886_v9 = vrot.slane %v1885_v7, 4  ;;  %v1875_v10 = vrot.slane %v1874_v8, 4 }
 0x18e   :  { %v1887_v12 = vadd.f32 %v1886_v9, %v1885_v7  ;;  %v1876_v13 = vadd.f32 %v1875_v10, %v1874_v8 }
 0x190   :  { %v1888_v14 = vrot.slane %v1887_v12, 2  ;;  %v1877_v15 = vrot.slane %v1876_v13, 2 }
 0x192   :  { %v1889_v17 = vadd.f32 %v1888_v14, %v1887_v12  ;;  %v1878_v18 = vadd.f32 %v1877_v15, %v1876_v13 }
 0x194   :  { %v1890_v19 = vrot.slane %v1889_v17, 1  ;;  %v1879_v20 = vrot.slane %v1878_v18, 1 }
 0x196   :  { %v1891_v22 = vadd.f32 %v1890_v19, %v1889_v17  ;;  %v1880_v23 = vadd.f32 %v1879_v20, %v1878_v18 }
 0x198   :  { %v1893_v25 = vadd.f32 %v1891_v22, %v1880_v23 }
 0x19a   :  { %v1894_v26 = vmul.f32 0.5, %v1893_v25 }
 0x19c   :  { %v1895_v27 = vadd.f32 %v1894_v26, %v1892_v24 }
 0x19e   :  { %v1896_v28 = vsub.f32 0.0, %v1895_v27 }
 0x1a0   :  { %1898 = vst.msk [vmem:[#allocation7] sm:$0x1] %vm1897_vm5, %v1896_v28 }
 0x1a1   :  { %2207 = shalt.err (!%p2204_p6)
}
 0x1a2   :  { %s2208_s9 = scalar_lea.hbm %s2433_s2, 16 }
 0x1a3   :  { %p2209_p7 = scmp.ne.s32.totalorder %s2433_s2, %s2208_s9  ;;  %p2212_p8 = scmp.lt.u32.totalorder %s2208_s9, %s2433_s2 }
 0x1a5   :  { %p2214_p9 = pnand %p2212_p8, %p2209_p7 }
 0x1a7   :  { %2217 = shalt.err (!%p2214_p9)
}
 0x1a8   :  { %1908 = dma.vmem_to_hbm [thread:$0]  %s1906_s4, 16, %s2433_s2, [#allocation4]  }
 0x1a9   :  { %2222 = dma.done.wait [#allocation4], 16  }
 0x1aa   :  { %2223 = vsyncadd [#allocation4], 4294967280 }
 0x1ab   :  { %1912 = vsyncpa [#allocation3], 1 }
 0x1ac   :  { %1913 = vsyncpa [#allocation6], 1 }
 0x1ad   :  { %1914 = vsyncpa [#allocation4], 1 }

</bundles_post_ra>
